<compile_context>
chip_gen: v6e
topology: v6e:2x2x1
jax: 0.10.0
libtpu: 0.0.40
codegen_flags: <defaults>
</compile_context>

<pallas_src>
import jax
import jax.numpy as jnp
from jax.experimental import pallas as pl
from jax.experimental.pallas import tpu as pltpu


def _round_up(x: int, m: int) -> int:
    return ((x + m - 1) // m) * m


def mirror_dupsampling_block_loss(seggt, conv_p_weight, conv_w_weight, *,
                                  num_class: int, scale: int, tm: int = 512):
    """Scalar MSE loss of MirrorDUpsamplingBlock.forward.

    seggt          : (N, 1, H, W) integer GT mask.
    conv_p_weight  : (inplanes, NSS)  == nn.Conv2d(NSS, inplanes, 1).weight[..., 0, 0]
    conv_w_weight  : (NSS, inplanes)  == du_block.conv_w.weight[..., 0, 0]
    tm             : pixels-per-tile (multiple of 8; use >=512 and 128/256-aligned
                     on real shapes; re-budget for v7x's 64 MiB VMEM).
    """
    N, one, H, W = seggt.shape
    assert one == 1, "seggt must be (N, 1, H, W)"
    C, s = int(num_class), int(scale)
    assert H % s == 0 and W % s == 0
    Hc, Wc = H // s, W // s
    SS = s * s
    NSS = C * SS
    IP = int(conv_p_weight.shape[0])
    assert conv_p_weight.shape == (IP, NSS)
    assert conv_w_weight.shape == (NSS, IP)

    M = N * Hc * Wc
    SS_pad = _round_up(SS, 8)            # sublane-friendly label width
    NSS_pad = _round_up(NSS, 128)        # lane-dense packed-channel width
    IP_pad = _round_up(IP, 128)          # lane-dense feature width

    tm = _round_up(max(8, min(tm, M)), 8)
    M_pad = _round_up(M, tm)
    num_tiles = M_pad // tm

    # ---- glue: pack sub-pixel labels (cheap, no one-hot in HBM) -------------
    # (N,H,W) -> (N,Hc,s,Wc,s) -> (N,Hc,Wc,s,s) -> (M, SS) with k = hs*s + ws,
    # matching mirror_process's channel packing j = hs*s*C + ws*C + c.
    labels = jnp.asarray(seggt, jnp.int32).reshape(N, H, W)
    lbl_packed = labels.reshape(N, Hc, s, Wc, s).transpose(0, 1, 3, 2, 4).reshape(M, SS)
    # Pad rows with label == C (matches nothing -> all-zero one-hot row, SSE 0).
    lbl_packed = jnp.pad(lbl_packed, ((0, M_pad - M), (0, SS_pad - SS)),
                         constant_values=C)

    # ---- glue: small VMEM-resident constants --------------------------------
    j = jnp.arange(NSS_pad)
    k = jnp.arange(SS_pad)
    valid = j < NSS
    # sel[k, j] = 1 if packed channel j belongs to sub-position k (j // C == k).
    sel = (((j[None, :] // C) == k[:, None]) & valid[None, :]).astype(jnp.float32)
    # cmp[0, j] = class index of packed channel j (or -1 on pad columns).
    cmp = jnp.where(valid, j % C, -1).astype(jnp.float32)[None, :]

    # Pre-transposed, zero-padded conv weights (bf16 for full MXU rate).
    wp = jnp.zeros((NSS_pad, IP_pad), jnp.bfloat16).at[:NSS, :IP].set(
        conv_p_weight.T.astype(jnp.bfloat16))
    ww = jnp.zeros((IP_pad, NSS_pad), jnp.bfloat16).at[:IP, :NSS].set(
        conv_w_weight.T.astype(jnp.bfloat16))

    # ---- fused kernel --------------------------------------------------------
    def kernel(lbl_ref, sel_ref, cmp_ref, wp_ref, ww_ref, sse_ref):
        lbl = lbl_ref[...]                                   # (tm, SS_pad) int32
        lbl = jnp.where(lbl > C, 0, lbl)                     # mask[mask > C] = 0
        lblf = lbl.astype(jnp.float32)
        # Expand sub-position labels across packed channels (exact small ints):
        # e[m, j] = label of sub-position j // C.
        e = jnp.dot(lblf, sel_ref[...], preferred_element_type=jnp.float32)
        # Packed one-hot built on the fly (never in HBM); pad columns stay 0.
        x = (jnp.abs(e - cmp_ref[...]) < 0.5).astype(jnp.bfloat16)   # (tm, NSS_pad)
        # conv_p (1x1): H = X @ Wp
        h = jnp.dot(x, wp_ref[...], preferred_element_type=jnp.float32)
        # conv_w (1x1): R = H @ Ww   (reconstruction; stays in VMEM)
        r = jnp.dot(h.astype(jnp.bfloat16), ww_ref[...],
                    preferred_element_type=jnp.float32)
        # Fused SSE partial for this tile (f32).
        d = r - x.astype(jnp.float32)
        sse = jnp.sum(d * d)
        sse_ref[...] = jnp.full(sse_ref.shape, sse, dtype=jnp.float32)

    partials = pl.pallas_call(
        kernel,
        out_shape=jax.ShapeDtypeStruct((num_tiles, 1, 128), jnp.float32),
        grid_spec=pltpu.PrefetchScalarGridSpec(
            num_scalar_prefetch=0,
            grid=(num_tiles,),
            in_specs=[
                pl.BlockSpec((tm, SS_pad), lambda i: (i, 0)),          # label tiles
                pl.BlockSpec((SS_pad, NSS_pad), lambda i: (0, 0)),     # resident
                pl.BlockSpec((1, NSS_pad), lambda i: (0, 0)),          # resident
                pl.BlockSpec((NSS_pad, IP_pad), lambda i: (0, 0)),     # resident Wp
                pl.BlockSpec((IP_pad, NSS_pad), lambda i: (0, 0)),     # resident Ww
            ],
            out_specs=pl.BlockSpec((1, 1, 128), lambda i: (i, 0, 0)),  # per-tile SSE
        ),
        compiler_params=pltpu.CompilerParams(
            dimension_semantics=("parallel",),   # per-tile partials -> race-free
        ),
    )(lbl_packed, sel, cmp, wp, ww)

    sse_total = jnp.sum(partials[:, 0, 0])
    # MSE mean over the packed tensor's TRUE element count N*NSS*(H/s)*(W/s).
    return sse_total / jnp.float32(M * NSS)


# ----------------------------- pure-JAX reference -----------------------------
def _reference_loss(seggt, conv_p_weight, conv_w_weight, num_class, scale):
    """Step-by-step port of the PyTorch module (for verification only)."""
    N, _, H, W = seggt.shape
    C, s = num_class, scale
    lbl = jnp.asarray(seggt, jnp.int32).reshape(N, H, W)
    lbl = jnp.where(lbl > C, 0, lbl)
    oh = jax.nn.one_hot(lbl, C, dtype=jnp.float32)            # == permute(0,2,3,1)
    x = oh.reshape(N, H, W // s, C * s)
    x = jnp.transpose(x, (0, 2, 1, 3))
    x = x.reshape(N, W // s, H // s, C * s * s)
    x = jnp.transpose(x, (0, 3, 2, 1))                        # (N, NSS, H/s, W/s)
    xm = jnp.transpose(x, (0, 2, 3, 1)).reshape(-1, C * s * s)
    h = jnp.dot(xm.astype(jnp.bfloat16), conv_p_weight.T.astype(jnp.bfloat16),
                preferred_element_type=jnp.float32)
    r = jnp.dot(h.astype(jnp.bfloat16), conv_w_weight.T.astype(jnp.bfloat16),
                preferred_element_type=jnp.float32)
    return jnp.mean((r - xm) ** 2)


if __name__ == "__main__":
    key = jax.random.PRNGKey(0)
    k1, k2, k3 = jax.random.split(key, 3)

    # Small shapes consistent with the module: N=2, C=4 classes, scale=2,
    # 24x24 GT mask, inplanes=64  -> NSS=16, M=288 (exercises M padding).
    N, num_class, scale, H, W, inplanes = 2, 4, 2, 24, 24, 64
    NSS = num_class * scale * scale

    # Labels include values == C (ignored -> zero row) and > C (clamped to 0).
    seggt = jax.random.randint(k1, (N, 1, H, W), 0, num_class + 2, dtype=jnp.int32)
    conv_p_w = jax.random.normal(k2, (inplanes, NSS), dtype=jnp.float32) * 0.1
    conv_w_w = jax.random.normal(k3, (NSS, inplanes), dtype=jnp.float32) * 0.1

    loss = mirror_dupsampling_block_loss(seggt, conv_p_w, conv_w_w,
                                         num_class=num_class, scale=scale, tm=128)
    loss = jax.block_until_ready(loss)

    ref = jax.block_until_ready(
        _reference_loss(seggt, conv_p_w, conv_w_w, num_class, scale))

    assert jnp.isfinite(loss), loss
    assert jnp.allclose(loss, ref, rtol=5e-3, atol=1e-6), (float(loss), float(ref))
    print("KERNEL_OK")
</pallas_src>

<mosaic_0001>
module attributes {stable_mosaic.version = 11 : i64} {
  func.func @kernel(%arg0: i32, %arg1: memref<128x8xi32, #tpu.memory_space<vmem>>, %arg2: memref<8x128xf32, #tpu.memory_space<vmem>>, %arg3: memref<1x128xf32, #tpu.memory_space<vmem>>, %arg4: memref<128x128xbf16, #tpu.memory_space<vmem>>, %arg5: memref<128x128xbf16, #tpu.memory_space<vmem>>, %arg6: memref<1x1x128xf32, #tpu.memory_space<vmem>>) attributes {dimension_semantics = [#tpu.dimension_semantics<parallel>], iteration_bounds = array<i64: 3>, scalar_prefetch = 0 : i64, scratch_operands = 0 : i64, tpu.core_type = #tpu.core_type<tc>, window_params = [{transform_indices = @transform_0, window_bounds = array<i64: 128, 8>}, {pipeline_mode = #tpu.pipeline_mode<synchronous>, transform_indices = @transform_1, window_bounds = array<i64: 8, 128>}, {pipeline_mode = #tpu.pipeline_mode<synchronous>, transform_indices = @transform_2, window_bounds = array<i64: 1, 128>}, {pipeline_mode = #tpu.pipeline_mode<synchronous>, transform_indices = @transform_3, window_bounds = array<i64: 128, 128>}, {pipeline_mode = #tpu.pipeline_mode<synchronous>, transform_indices = @transform_4, window_bounds = array<i64: 128, 128>}, {transform_indices = @transform_5, window_bounds = array<i64: 1, 1, 128>}]} {
    %c0 = arith.constant 0 : index
    %c0_0 = arith.constant 0 : index
    %0 = vector.load %arg1[%c0, %c0_0] : memref<128x8xi32, #tpu.memory_space<vmem>>, vector<128x8xi32>
    %c4_i32 = arith.constant 4 : i32
    %1 = vector.broadcast %c4_i32 : i32 to vector<128x8xi32>
    %2 = arith.cmpi sgt, %0, %1 : vector<128x8xi32>
    %c0_i32 = arith.constant 0 : i32
    %3 = vector.broadcast %c0_i32 : i32 to vector<128x8xi32>
    %4 = arith.select %2, %3, %0 : vector<128x8xi1>, vector<128x8xi32>
    %5 = arith.sitofp %4 : vector<128x8xi32> to vector<128x8xf32>
    %c0_1 = arith.constant 0 : index
    %c0_2 = arith.constant 0 : index
    %6 = vector.load %arg2[%c0_1, %c0_2] : memref<8x128xf32, #tpu.memory_space<vmem>>, vector<8x128xf32>
    %cst = arith.constant dense<0.000000e+00> : vector<128x128xf32>
    %7 = tpu.matmul %5, %6, %cst {dimension_numbers = #tpu.dot_dimension_numbers<[1], [0], [0], [1], [0, 0, 1, 1], [], []>} : vector<128x8xf32>, vector<8x128xf32>, vector<128x128xf32> -> vector<128x128xf32>
    %c0_3 = arith.constant 0 : index
    %c0_4 = arith.constant 0 : index
    %8 = vector.load %arg3[%c0_3, %c0_4] : memref<1x128xf32, #tpu.memory_space<vmem>>, vector<1x128xf32>
    %9 = vector.broadcast %8 : vector<1x128xf32> to vector<128x128xf32>
    %10 = arith.subf %7, %9 : vector<128x128xf32>
    %11 = math.absf %10 : vector<128x128xf32>
    %cst_5 = arith.constant 5.000000e-01 : f32
    %12 = vector.broadcast %cst_5 : f32 to vector<128x128xf32>
    %13 = arith.cmpf olt, %11, %12 : vector<128x128xf32>
    %14 = arith.extui %13 : vector<128x128xi1> to vector<128x128xi32>
    %15 = arith.sitofp %14 : vector<128x128xi32> to vector<128x128xf32>
    %16 = arith.truncf %15 : vector<128x128xf32> to vector<128x128xbf16>
    %c0_6 = arith.constant 0 : index
    %c0_7 = arith.constant 0 : index
    %17 = vector.load %arg4[%c0_6, %c0_7] : memref<128x128xbf16, #tpu.memory_space<vmem>>, vector<128x128xbf16>
    %cst_8 = arith.constant dense<0.000000e+00> : vector<128x128xf32>
    %18 = tpu.matmul %16, %17, %cst_8 {dimension_numbers = #tpu.dot_dimension_numbers<[1], [0], [0], [1], [0, 0, 1, 1], [], []>} : vector<128x128xbf16>, vector<128x128xbf16>, vector<128x128xf32> -> vector<128x128xf32>
    %19 = arith.truncf %18 : vector<128x128xf32> to vector<128x128xbf16>
    %c0_9 = arith.constant 0 : index
    %c0_10 = arith.constant 0 : index
    %20 = vector.load %arg5[%c0_9, %c0_10] : memref<128x128xbf16, #tpu.memory_space<vmem>>, vector<128x128xbf16>
    %cst_11 = arith.constant dense<0.000000e+00> : vector<128x128xf32>
    %21 = tpu.matmul %19, %20, %cst_11 {dimension_numbers = #tpu.dot_dimension_numbers<[1], [0], [0], [1], [0, 0, 1, 1], [], []>} : vector<128x128xbf16>, vector<128x128xbf16>, vector<128x128xf32> -> vector<128x128xf32>
    %22 = arith.extf %16 : vector<128x128xbf16> to vector<128x128xf32>
    %23 = arith.subf %21, %22 : vector<128x128xf32>
    %24 = arith.mulf %23, %23 : vector<128x128xf32>
    %25 = vector.shape_cast %24 : vector<128x128xf32> to vector<1x128x128xf32>
    %cst_12 = arith.constant dense<0.000000e+00> : vector<1xf32>
    %26 = vector.multi_reduction <add>, %25, %cst_12 [1, 2] : vector<1x128x128xf32> to vector<1xf32>
    %27 = vector.shape_cast %26 : vector<1xf32> to vector<1x1x1xf32>
    %28 = vector.extract %27[0, 0, 0] : f32 from vector<1x1x1xf32>
    %29 = vector.broadcast %28 : f32 to vector<1x1x128xf32>
    %c0_13 = arith.constant 0 : index
    %c0_14 = arith.constant 0 : index
    %c0_15 = arith.constant 0 : index
    %30 = vector.load %arg6[%c0_13, %c0_14, %c0_15] : memref<1x1x128xf32, #tpu.memory_space<vmem>>, vector<1x1x128xf32>
    tpu.vector_store %arg6[%c0_13, %c0_14, %c0_15], %29 {strides = array<i32>} : memref<1x1x128xf32, #tpu.memory_space<vmem>>, vector<1x1x128xf32>,
    return
  }
  func.func @transform_0(%arg0: i32) -> (i32, i32) {
    %c0_i32 = arith.constant 0 : i32
    %c0_i32_0 = arith.constant 0 : i32
    return %arg0, %c0_i32 : i32, i32
  }
  func.func @transform_1(%arg0: i32) -> (i32, i32) {
    %c0_i32 = arith.constant 0 : i32
    %c0_i32_0 = arith.constant 0 : i32
    %c0_i32_1 = arith.constant 0 : i32
    return %c0_i32, %c0_i32_0 : i32, i32
  }
  func.func @transform_2(%arg0: i32) -> (i32, i32) {
    %c0_i32 = arith.constant 0 : i32
    %c0_i32_0 = arith.constant 0 : i32
    %c0_i32_1 = arith.constant 0 : i32
    return %c0_i32, %c0_i32_0 : i32, i32
  }
  func.func @transform_3(%arg0: i32) -> (i32, i32) {
    %c0_i32 = arith.constant 0 : i32
    %c0_i32_0 = arith.constant 0 : i32
    %c0_i32_1 = arith.constant 0 : i32
    return %c0_i32, %c0_i32_0 : i32, i32
  }
  func.func @transform_4(%arg0: i32) -> (i32, i32) {
    %c0_i32 = arith.constant 0 : i32
    %c0_i32_0 = arith.constant 0 : i32
    %c0_i32_1 = arith.constant 0 : i32
    return %c0_i32, %c0_i32_0 : i32, i32
  }
  func.func @transform_5(%arg0: i32) -> (i32, i32, i32) {
    %c0_i32 = arith.constant 0 : i32
    %c0_i32_0 = arith.constant 0 : i32
    %c0_i32_1 = arith.constant 0 : i32
    return %arg0, %c0_i32, %c0_i32_0 : i32, i32, i32
  }
}

</mosaic_0001>

<bundles_post_ra>
// kernel: tpu_custom_call.1
= control target key start
LH: loop header
LB: loop body
LE: loop exit
PB: predicated region body
PF: predicated region fallthrough
CT: control target
= control target key end

     0   :  { %10 = vsyncpa [#allocation3], 0  ;;  %s1784_s0 = inlined_call_operand.vmem [shape: s32[384,8], index: 0, kind: input, shape index: {}]   ;;  %s1785_s1 = inlined_call_operand.vmem [shape: f32[8,128], index: 1, kind: input, shape index: {}]   ;;  %s1786_s2 = inlined_call_operand.vmem [shape: f32[1,128], index: 2, kind: input, shape index: {}]   ;;  %s1787_s3 = inlined_call_operand.vmem [shape: bf16[128,128], index: 3, kind: input, shape index: {}]   ;;  %s1788_s4 = inlined_call_operand.vmem [shape: bf16[128,128], index: 4, kind: input, shape index: {}]   ;;  %s1789_s5 = inlined_call_operand.hbm [shape: f32[3,1,128], index: 5, kind: output, shape index: {}]  }
   0x1   :  { %12 = vsyncpa [#allocation3 + $0x1], 0  ;;  %s1450_s18 = smov 0   ;;  %s1452_s19 = smov 0  }
   0x2   :  { %s1454_s20 = smov 0   ;;  %s1456_s21 = smov 0  }
   0x3 LB: > { %s1050_s22 = sadd.s32 4294967295, %s1415_s21   ;;  %s1051_s23 = sadd.s32 4294967294, %s1415_s21   ;;  %s1415_s21 = sphi %s1456_s21, %s1799_s21   ;;  %s1411_s20 = sphi %s1454_s20, %s1798_s20   ;;  %s1407_s19 = sphi %s1452_s19, %s1797_s19   ;;  %s1403_s18 = sphi %s1450_s18, %s1796_s18  }
   0x4   : > { %s1473_s24 = sadd.s32 1, %s1415_s21   ;;  %s135_s25 = sadd.s32 1, %s1411_s20 }
   0x5   : > { %s132_s26 = ssub.s32 %s1415_s21, %s1473_s24  ;;  %p145_p0 = scmp.ne.s32.totalorder %s1411_s20, %s1407_s19 }
   0x6   : > { %p133_p1 = scmp.eq.s32.totalorder %s132_s26, 0  ;;  %p146_p2 = scmp.eq.s32.totalorder %s1050_s22, 2 }
   0x7   : > { %p151_p3 = scmp.ne.s32.totalorder %s1407_s19, %s1403_s18  ;;  %p152_p4 = scmp.eq.s32.totalorder %s1051_s23, 2 }
   0x8   : > { %s1483_s27 = scalar_select %p133_p1, %s1411_s20, %s135_s25  }
   0x9   : > { %p1485_p5 = por %p146_p2, %p145_p0  ;;  %p1489_p6 = por %p152_p4, %p151_p3 }
   0xa   : > { %p1054_p7 = scmp.ge.s32.totalorder %s1415_s21, 1  ;;  %p191_p8 = scmp.lt.s32.totalorder %s1415_s21, 4 }
   0xc   : > { %p192_p9 = pnand %p1054_p7, %p191_p8 }
   0xd   : > { %s1498_s7 = sshll.u32 (!%p192_p9), %s1050_s22, 4  ;;  %s1419_s8 = smov (!%p192_p9), [#allocation2]  }
   0xe   : > { %195 = sbr.rel (%p192_p9) target bundleno = 882 (0x372), region = 40  ;;  %p219_p10 = scmp.lt.s32.totalorder (!%p192_p9), %s1498_s7, 47 }
   0xf   : > { %s994_s26 = scalar_lea.hbm (!%p192_p9), %s1789_s5, %s1498_s7  ;;  %s1359_s9 = sshll.u32 (!%p192_p9), %s1419_s8, 4  ;;  %s1360_s9 = int_to_ptr.vmem [resolvable:$false] %s1359_s9 }
  0x10   : > { %s1361_s10 = scalar_lea.vmem (!%p192_p9), %s1360_s9, 32 }
  0x13   : > { %v289_v0 = vld [vmem:[%s1785_s1] sm:$0xff]  ;;  %v1339_v1 = vld [vmem:[%s1787_s3 + $0x38] sm:$0xff]   ;;  %v1340_v2 = vld [vmem:[%s1787_s3 + $0x30] sm:$0xff]   ;;  %s220_s12 = scalar_select %p219_p10, %s1498_s7, 47  ;;  %vm290_vm0 = vcmask 64512  }
  0x14   : > { %1206 = vmatprep.subr.mxu0 %v289_v0  ;;  %1232 = vmatprep.subr.bf16.mxu1 %v1339_v1  ;;  %v1341_v3 = vld [vmem:[%s1787_s3 + $0x28] sm:$0xff]   ;;  %v1342_v11 = vld [vmem:[%s1787_s3 + $0x20] sm:$0xff]   ;;  %v1343_v20 = vld [vmem:[%s1787_s3 + $0x18] sm:$0xff]  }
  0x15   : > { %1207 = vmatpush3.msra.mxu0 %v289_v0  ;;  %1233 = vmatpush3.bf16.msra.mxu1 %v1339_v1  ;;  %s1056_s15 = sshll.u32 %s220_s12, 3  ;;  %v1344_v54 = vld [vmem:[%s1787_s3 + $0x10] sm:$0xff]   ;;  %v1345_v55 = vld [vmem:[%s1787_s3 + $0x8] sm:$0xff]   ;;  %v1346_v56 = vld [vmem:[%s1787_s3] sm:$0xff]  }
  0x16   : > { %1234 = vmatprep.subr.bf16.mxu1 %v1340_v2  ;;  %s1514_s22 = scalar_lea.vmem %s1784_s0, %s1056_s15  ;;  %v1347_v57 = vld [vmem:[%s1788_s4 + $0x38] sm:$0xff]   ;;  %v1348_v58 = vld [vmem:[%s1788_s4 + $0x30] sm:$0xff]   ;;  %v1349_v59 = vld [vmem:[%s1788_s4 + $0x28] sm:$0xff]   ;;  %s216_s15 = sand.u32 1, %s1407_s19  }
  0x17   : > { %v225_v4 = vld [vmem:[%s1514_s22] sm:$0xff]  ;;  %v226_v5 = vld [vmem:[%s1514_s22 + $0x8] sm:$0xff]  ;;  %v227_v6 = vld [vmem:[%s1514_s22 + $0x10] sm:$0xff]  ;;  %1264 = vmatprep.subr.bf16.mxu0 %v1347_v57  ;;  %s217_s16 = scalar_lea.vmem [#allocation2], %s216_s15  ;;  %s984_s30 = scalar_lea.sflag [#allocation3], %s216_s15 }
  0x18   : > { %vm241_vm1 = vcmp.gt.s32.totalorder %v225_v4, 4  ;;  %v1057_v7 = vcvt.s32.f32 %v225_v4  ;;  %vm242_vm2 = vcmp.gt.s32.totalorder %v226_v5, 4  ;;  %v1059_v8 = vcvt.s32.f32 %v226_v5  ;;  %v228_v9 = vld [vmem:[%s1514_s22 + $0x18] sm:$0xff]  ;;  %v229_v10 = vld [vmem:[%s1514_s22 + $0x20] sm:$0xff]  ;;  %v230_v17 = vld [vmem:[%s1514_s22 + $0x28] sm:$0xff]  ;;  %s996_s17 = sshll.u32 %s217_s16, 4  ;;  %s1745_s17 = int_to_ptr.vmem [resolvable:$true] %s996_s17 }
  0x19   : > { %1235 = vmatpush3.bf16.msra.mxu1 %v1340_v2  ;;  %vm243_vm3 = vcmp.gt.s32.totalorder %v227_v6, 4  ;;  %v1061_v12 = vcvt.s32.f32 %v227_v6  ;;  %v1063_v13 = vcvt.s32.f32 %v228_v9  ;;  %vm244_vm4 = vcmp.gt.s32.totalorder %v228_v9, 4  ;;  %v231_v19 = vld [vmem:[%s1514_s22 + $0x30] sm:$0xff]  ;;  %v232_v25 = vld [vmem:[%s1514_s22 + $0x38] sm:$0xff]  ;;  %v233_v26 = vld [vmem:[%s1514_s22 + $0x40] sm:$0xff]  ;;  %s1355_s6 = scalar_lea.vmem %s1745_s17, 16  ;;  %p1362_p0 = scmp.lt.s32.totalorder %s1745_s17, %s1360_s9 }
  0x1a   : > { %1236 = vmatprep.subr.bf16.mxu1 %v1341_v3  ;;  %v1058_v14 = vsel %vm241_vm1, 0.0, %v1057_v7  ;;  %v1060_v15 = vsel %vm242_vm2, 0.0, %v1059_v8  ;;  %v1065_v16 = vcvt.s32.f32 %v229_v10  ;;  %vm245_vm5 = vcmp.gt.s32.totalorder %v229_v10, 4  ;;  %v234_v31 = vld [vmem:[%s1514_s22 + $0x48] sm:$0xff]  ;;  %v235_v32 = vld [vmem:[%s1514_s22 + $0x50] sm:$0xff]  ;;  %v236_v35 = vld [vmem:[%s1514_s22 + $0x58] sm:$0xff]  ;;  %p1356_p11 = scmp.ne.s32.totalorder %s1745_s17, %s1355_s6  ;;  %p1363_p1 = scmp.lt.s32.totalorder %s1361_s10, %s1355_s6 }
  0x1b   : > { %1208 = vmatprep.mubr.msk.f32.mxu0 %vm290_vm0, %v1058_v14  ;;  %v1062_v18 = vsel %vm243_vm3, 0.0, %v1061_v12  ;;  %v1064_v21 = vsel %vm244_vm4, 0.0, %v1063_v13  ;;  %v1067_v22 = vcvt.s32.f32 %v230_v17  ;;  %vm246_vm6 = vcmp.gt.s32.totalorder %v230_v17, 4  ;;  %v237_v38 = vld [vmem:[%s1514_s22 + $0x60] sm:$0xff]  ;;  %v238_v43 = vld [vmem:[%s1514_s22 + $0x68] sm:$0xff]  ;;  %v239_v44 = vld [vmem:[%s1514_s22 + $0x70] sm:$0xff] }
  0x1c   : > { %1209 = vmatmul.mubr.msk.f32.vlgmr.msra.gmra.mxu0 %vm290_vm0, %v1060_v15  ;;  %v1066_v23 = vsel %vm245_vm5, 0.0, %v1065_v16  ;;  %v1069_v24 = vcvt.s32.f32 %v231_v19  ;;  %vm247_vm7 = vcmp.gt.s32.totalorder %v231_v19, 4  ;;  %v1071_v28 = vcvt.s32.f32 %v232_v25  ;;  %v240_v49 = vld [vmem:[%s1514_s22 + $0x78] sm:$0xff]  ;;  %v1350_v60 = vld [vmem:[%s1788_s4 + $0x20] sm:$0xff]   ;;  %v1352_v62 = vld [vmem:[%s1788_s4 + $0x10] sm:$0xff]   ;;  %p1357_p12 = pnand %p1356_p11, %p1485_p5  ;;  %p1364_p2 = por %p1363_p1, %p1362_p0 }
  0x1d   : > { %1237 = vmatpush3.bf16.msra.mxu1 %v1341_v3  ;;  %1211 = vmatprep.mubr.msk.f32.mxu0 %vm290_vm0, %v1062_v18  ;;  %v1068_v27 = vsel %vm246_vm6, 0.0, %v1067_v22  ;;  %vm248_vm8 = vcmp.gt.s32.totalorder %v232_v25, 4  ;;  %v1073_v30 = vcvt.s32.f32 %v233_v26  ;;  %vm249_vm9 = vcmp.gt.s32.totalorder %v233_v26, 4  ;;  %v1351_v61 = vld [vmem:[%s1788_s4 + $0x18] sm:$0xff]   ;;  %v1584_v63 = vld [vmem:[%s1786_s2] ss:$0 sm:$0xff] }
  0x1e   : > { %1238 = vmatprep.subr.bf16.mxu1 %v1342_v11  ;;  %v1070_v29 = vsel %vm247_vm7, 0.0, %v1069_v24  ;;  %v1072_v33 = vsel %vm248_vm8, 0.0, %v1071_v28  ;;  %v1075_v34 = vcvt.s32.f32 %v234_v31  ;;  %vm250_vm10 = vcmp.gt.s32.totalorder %v234_v31, 4  ;;  %1265 = vmatpush3.bf16.msra.mxu0 %v1347_v57  ;;  %p1358_p13 = pneg %p1357_p12 }
  0x1f   : > { %v1074_v36 = vsel %vm249_vm9, 0.0, %v1073_v30  ;;  %v1077_v37 = vcvt.s32.f32 %v235_v32  ;;  %vm251_vm11 = vcmp.gt.s32.totalorder %v235_v32, 4  ;;  %v1079_v40 = vcvt.s32.f32 %v236_v35  ;;  %1266 = vmatprep.subr.bf16.mxu0 %v1348_v58 }
  0x20   : > { %1212 = vmatmul.mubr.msk.f32.gmra.mxu0 %vm290_vm0, %v1064_v21  ;;  %v1076_v39 = vsel %vm250_vm10, 0.0, %v1075_v34  ;;  %vm252_vm12 = vcmp.gt.s32.totalorder %v236_v35, 4  ;;  %v1081_v42 = vcvt.s32.f32 %v237_v38  ;;  %vm253_vm13 = vcmp.gt.s32.totalorder %v237_v38, 4  ;;  %p1365_p3 = pnand %p1364_p2, %p1358_p13 }
  0x21   : > { %1239 = vmatpush3.bf16.msra.mxu1 %v1342_v11  ;;  %1214 = vmatprep.mubr.msk.f32.mxu0 %vm290_vm0, %v1066_v23  ;;  %v1078_v41 = vsel %vm251_vm11, 0.0, %v1077_v37  ;;  %v1080_v45 = vsel %vm252_vm12, 0.0, %v1079_v40  ;;  %v1083_v46 = vcvt.s32.f32 %v238_v43  ;;  %vm254_vm14 = vcmp.gt.s32.totalorder %v238_v43, 4 }
  0x22   : > { %1240 = vmatprep.subr.bf16.mxu1 %v1343_v20  ;;  %v1082_v47 = vsel %vm253_vm13, 0.0, %v1081_v42  ;;  %v1085_v48 = vcvt.s32.f32 %v239_v44  ;;  %vm255_vm15 = vcmp.gt.s32.totalorder %v239_v44, 4  ;;  %v1087_v51 = vcvt.s32.f32 %v240_v49  ;;  %1267 = vmatpush3.bf16.msra.mxu0 %v1348_v58 }
  0x23   : > { %v1084_v50 = vsel %vm254_vm14, 0.0, %v1083_v46  ;;  %vm256_vm1 = vcmp.gt.s32.totalorder %v240_v49, 4  ;;  %1268 = vmatprep.subr.bf16.mxu0 %v1349_v59  ;;  %v1417_v14 = vmov 1.0|1.0   ;;  %v1353_v49 = vld [vmem:[%s1788_s4 + $0x8] sm:$0xff]  }
  0x24   : > { %1215 = vmatmul.mubr.msk.f32.gmra.mxu0 %vm290_vm0, %v1068_v27  ;;  %v1086_v52 = vsel %vm255_vm15, 0.0, %v1085_v48  ;;  %v1088_v53 = vsel %vm256_vm1, 0.0, %v1087_v51 }
  0x25   : > { %1241 = vmatpush3.bf16.msra.mxu1 %v1343_v20  ;;  %1217 = vmatprep.mubr.msk.f32.mxu0 %vm290_vm0, %v1070_v29 }
  0x26   : > { %1242 = vmatprep.subr.bf16.mxu1 %v1344_v54  ;;  %1269 = vmatpush3.bf16.msra.mxu0 %v1349_v59 }
  0x27   : > { %1270 = vmatprep.subr.bf16.mxu0 %v1350_v60 }
  0x28   : > { %1218 = vmatmul.mubr.msk.f32.gmra.mxu0 %vm290_vm0, %v1072_v33 }
  0x29   : > { %1220 = vmatprep.mubr.msk.f32.mxu0 %vm290_vm0, %v1074_v36  ;;  %1243 = vmatpush3.bf16.msra.mxu1 %v1344_v54 }
  0x2a   : > { %1244 = vmatprep.subr.bf16.mxu1 %v1345_v55  ;;  %1271 = vmatpush3.bf16.msra.mxu0 %v1350_v60 }
  0x2b   : > { %1272 = vmatprep.subr.bf16.mxu0 %v1351_v61 }
  0x2c   : > { %1221 = vmatmul.mubr.msk.f32.gmra.mxu0 %vm290_vm0, %v1076_v39 }
  0x2d   : > { %1223 = vmatprep.mubr.msk.f32.mxu0 %vm290_vm0, %v1078_v41  ;;  %1245 = vmatpush3.bf16.msra.mxu1 %v1345_v55 }
  0x2e   : > { %1246 = vmatprep.subr.bf16.mxu1 %v1346_v56  ;;  %1273 = vmatpush3.bf16.msra.mxu0 %v1351_v61 }
  0x2f   : > { %1274 = vmatprep.subr.bf16.mxu0 %v1352_v62 }
  0x30   : > { %1224 = vmatmul.mubr.msk.f32.gmra.mxu0 %vm290_vm0, %v1080_v45 }
  0x31   : > { %1226 = vmatprep.mubr.msk.f32.mxu0 %vm290_vm0, %v1082_v47  ;;  %1247 = vmatpush3.bf16.msra.mxu1 %v1346_v56 }
  0x32   : > { %1275 = vmatpush3.bf16.msra.mxu0 %v1352_v62 }
  0x33   : > { %1276 = vmatprep.subr.bf16.mxu0 %v1353_v49 }
  0x34   : > { %1227 = vmatmul.mubr.msk.f32.gmra.mxu0 %vm290_vm0, %v1084_v50  ;;  %v1354_v50 = vld [vmem:[%s1788_s4] sm:$0xff]  }
  0x35   : > { %1229 = vmatprep.mubr.msk.f32.mxu0 %vm290_vm0, %v1086_v52 }
  0x36   : > { %1277 = vmatpush3.bf16.msra.mxu0 %v1353_v49 }
  0x37   : > { %1278 = vmatprep.subr.bf16.mxu0 %v1354_v50 }
  0x38   : > { %1230 = vmatmul.mubr.msk.f32.gmra.mxu0 %vm290_vm0, %v1088_v53 }
  0x3a   : > { %1279 = vmatpush3.bf16.msra.mxu0 %v1354_v50 }
  0xdc   : > { %v1210_v0 = vpop.f32.mrf.mxu0 }
  0xdd   : > { %v492_v1 = vsub.f32 %v1210_v0, %v1584_v63 }
  0xde   : > { %v405_v2 = vpop.f32.mrf.mxu0 }
  0xdf   : > { %v1587_v3 = vand.u32 2147483647, %v492_v1  ;;  %v491_v4 = vsub.f32 %v405_v2, %v1584_v63 }
  0xe0   : > { %v1213_v5 = vpop.f32.mrf.mxu0 }
  0xe1   : > { %v1590_v6 = vand.u32 2147483647, %v491_v4  ;;  %v494_v7 = vsub.f32 %v1213_v5, %v1584_v63  ;;  %vm524_vm2 = vcmp.lt.f32.partialorder %v1587_v3, 0.5 }
  0xe2   : > { %v415_v8 = vpop.f32.mrf.mxu0 }
  0xe3   : > { %v1593_v9 = vand.u32 2147483647, %v494_v7  ;;  %v493_v10 = vsub.f32 %v415_v8, %v1584_v63  ;;  %vm523_vm0 = vcmp.lt.f32.partialorder %v1590_v6, 0.5 }
  0xe4   : > { %v1216_v11 = vpop.f32.mrf.mxu0  ;;  %vm1130_vm3 = vmpackc.low %vm524_vm2, %vm523_vm0 }
  0xe5   : > { %v1602_v12 = vand.u32 2147483647, %v493_v10  ;;  %v496_v13 = vsub.f32 %v1216_v11, %v1584_v63  ;;  %1248 = vmatprep.mubr.msk.bf16.mxu1 %vm1130_vm3, %v1417_v14  ;;  %vm526_vm4 = vcmp.lt.f32.partialorder %v1593_v9, 0.5 }
  0xe6   : > { %v425_v15 = vpop.f32.mrf.mxu0 }
  0xe7   : > { %vm525_vm5 = vcmp.lt.f32.partialorder %v1602_v12, 0.5  ;;  %v1608_v16 = vand.u32 2147483647, %v496_v13  ;;  %v495_v17 = vsub.f32 %v425_v15, %v1584_v63 }
  0xe8   : > { %vm1132_vm6 = vmpackc.low %vm526_vm4, %vm525_vm5  ;;  %v1219_v18 = vpop.f32.mrf.mxu0 }
  0xe9   : > { %v1615_v19 = vand.u32 2147483647, %v495_v17  ;;  %v498_v20 = vsub.f32 %v1219_v18, %v1584_v63  ;;  %1249 = vmatmul.mubr.msk.bf16.vlgmr.msra.gmra.mxu1 %vm1132_vm6, %v1417_v14  ;;  %vm528_vm7 = vcmp.lt.f32.partialorder %v1608_v16, 0.5  ;;  %v1418_v18 = vmov 0.0  }
  0xea   : > { %v435_v21 = vpop.f32.mrf.mxu0 }
  0xeb   : > { %vm527_vm8 = vcmp.lt.f32.partialorder %v1615_v19, 0.5  ;;  %v1621_v22 = vand.u32 2147483647, %v498_v20  ;;  %v497_v23 = vsub.f32 %v435_v21, %v1584_v63  ;;  %v1106_v20 = vsel %vm523_vm0, 1.0, %v1418_v18 }
  0xec   : > { %vm1134_vm9 = vmpackc.low %vm528_vm7, %vm527_vm8  ;;  %v1222_v24 = vpop.f32.mrf.mxu0  ;;  %v1110_v12 = vsel %vm527_vm8, 1.0, %v1418_v18 }
  0xed   : > { %v1628_v25 = vand.u32 2147483647, %v497_v23  ;;  %v500_v26 = vsub.f32 %v1222_v24, %v1584_v63  ;;  %1252 = vmatprep.mubr.msk.bf16.mxu1 %vm1134_vm9, %v1417_v14  ;;  %vm530_vm10 = vcmp.lt.f32.partialorder %v1621_v22, 0.5  ;;  %v1108_v24 = vsel %vm525_vm5, 1.0, %v1418_v18 }
  0xee   : > { %v445_v27 = vpop.f32.mrf.mxu0 }
  0xef   : > { %vm529_vm11 = vcmp.lt.f32.partialorder %v1628_v25, 0.5  ;;  %v1634_v28 = vand.u32 2147483647, %v500_v26  ;;  %v499_v29 = vsub.f32 %v445_v27, %v1584_v63  ;;  %v1107_v26 = vsel %vm524_vm2, 1.0, %v1418_v18 }
  0xf0   : > { %vm1136_vm12 = vmpackc.low %vm530_vm10, %vm529_vm11  ;;  %v1225_v30 = vpop.f32.mrf.mxu0  ;;  %v1112_v9 = vsel %vm529_vm11, 1.0, %v1418_v18 }
  0xf1   : > { %v1641_v31 = vand.u32 2147483647, %v499_v29  ;;  %v502_v32 = vsub.f32 %v1225_v30, %v1584_v63  ;;  %1253 = vmatmul.mubr.msk.bf16.gmra.mxu1 %vm1136_vm12, %v1417_v14  ;;  %vm1791_vm13 = vcmp.lt.f32.partialorder %v1634_v28, 0.5  ;;  %vm1794_vm0 = vcmp.lt.f32.partialorder %v1634_v28, 0.5 }
  0xf2   : > { %v455_v33 = vpop.f32.mrf.mxu0 }
  0xf3   : > { %vm531_vm14 = vcmp.lt.f32.partialorder %v1641_v31, 0.5  ;;  %v1647_v34 = vand.u32 2147483647, %v502_v32  ;;  %v501_v35 = vsub.f32 %v455_v33, %v1584_v63  ;;  %v1109_v32 = vsel %vm526_vm4, 1.0, %v1418_v18 }
  0xf4   : > { %vm1138_vm15 = vmpackc.low %vm1791_vm13, %vm531_vm14  ;;  %v1228_v36 = vpop.f32.mrf.mxu0  ;;  %v1114_v25 = vsel %vm531_vm14, 1.0, %v1418_v18 }
  0xf5   : > { %v1654_v37 = vand.u32 2147483647, %v501_v35  ;;  %v504_v38 = vsub.f32 %v1228_v36, %v1584_v63  ;;  %1256 = vmatprep.mubr.msk.bf16.mxu1 %vm1138_vm15, %v1417_v14  ;;  %vm1790_vm1 = vcmp.lt.f32.partialorder %v1647_v34, 0.5  ;;  %vm1795_vm2 = vcmp.lt.f32.partialorder %v1647_v34, 0.5 }
  0xf6   : > { %v465_v39 = vpop.f32.mrf.mxu0 }
  0xf7   : > { %vm533_vm3 = vcmp.lt.f32.partialorder %v1654_v37, 0.5  ;;  %v1660_v40 = vand.u32 2147483647, %v504_v38  ;;  %v503_v41 = vsub.f32 %v465_v39, %v1584_v63 }
  0xf8   : > { %vm1140_vm6 = vmpackc.low %vm1790_vm1, %vm533_vm3  ;;  %v1231_v42 = vpop.f32.mrf.mxu0  ;;  %v1116_v22 = vsel %vm533_vm3, 1.0, %v1418_v18 }
  0xf9   : > { %v1667_v43 = vand.u32 2147483647, %v503_v41  ;;  %v506_v44 = vsub.f32 %v1231_v42, %v1584_v63  ;;  %1257 = vmatmul.mubr.msk.bf16.gmra.mxu1 %vm1140_vm6, %v1417_v14  ;;  %vm536_vm9 = vcmp.lt.f32.partialorder %v1660_v40, 0.5 }
  0xfa   : > { %v475_v45 = vpop.f32.mrf.mxu0 }
  0xfb   : > { %vm535_vm12 = vcmp.lt.f32.partialorder %v1667_v43, 0.5  ;;  %v1673_v46 = vand.u32 2147483647, %v506_v44  ;;  %v505_v47 = vsub.f32 %v475_v45, %v1584_v63 }
  0xfc   : > { %vm1142_vm15 = vmpackc.low %vm536_vm9, %vm535_vm12  ;;  %v1118_v37 = vsel %vm535_vm12, 1.0, %v1418_v18 }
  0xfd   : > { %v1680_v48 = vand.u32 2147483647, %v505_v47  ;;  %1260 = vmatprep.mubr.msk.bf16.mxu1 %vm1142_vm15, %v1417_v14  ;;  %vm538_vm6 = vcmp.lt.f32.partialorder %v1673_v46, 0.5  ;;  %v1111_v47 = vsel %vm528_vm7, 1.0, %v1418_v18 }
  0xff   : > { %vm537_vm1 = vcmp.lt.f32.partialorder %v1680_v48, 0.5 }
 0x100   : > { %vm1144_vm13 = vmpackc.low %vm538_vm6, %vm537_vm1  ;;  %v1120_v34 = vsel %vm537_vm1, 1.0, %v1418_v18 }
 0x101   : > { %1261 = vmatmul.mubr.msk.bf16.gmra.mxu1 %vm1144_vm13, %v1417_v14 }
 0x1a9   : > { %v1250_v51 = vpop.f32.mrf.mxu1 }
 0x1ab   : > { %v677_v52 = vpop.f32.mrf.mxu1 }
 0x1ad   : > { %v1251_v53 = vpop.f32.mrf.mxu1 }
 0x1ae   : > { %v741_v56 = vpack.c.bf16 %v1251_v53, %v1250_v51  ;;  %v1113_v53 = vsel %vm530_vm10, 1.0, %v1418_v18 }
 0x1af   : > { %v680_v54 = vpop.f32.mrf.mxu1 }
 0x1b0   : > { %v740_v55 = vpack.c.bf16 %v680_v54, %v677_v52 }
 0x1b1   : > { %v1254_v57 = vpop.f32.mrf.mxu1 }
 0x1b2   : > { %1280 = vmatprep.mubr.bf16.mxu0 %v740_v55 }
 0x1b3   : > { %v693_v58 = vpop.f32.mrf.mxu1  ;;  %1281 = vmatmul.mubr.bf16.vlgmr.msra.gmra.mxu0 %v741_v56 }
 0x1b5   : > { %v1255_v59 = vpop.f32.mrf.mxu1 }
 0x1b6   : > { %v743_v62 = vpack.c.bf16 %v1255_v59, %v1254_v57 }
 0x1b7   : > { %v696_v60 = vpop.f32.mrf.mxu1 }
 0x1b8   : > { %v742_v61 = vpack.c.bf16 %v696_v60, %v693_v58 }
 0x1b9   : > { %v1258_v63 = vpop.f32.mrf.mxu1 }
 0x1ba   : > { %1284 = vmatprep.mubr.bf16.mxu0 %v742_v61 }
 0x1bb   : > { %v709_v0 = vpop.f32.mrf.mxu1  ;;  %1285 = vmatmul.mubr.bf16.gmra.mxu0 %v743_v62 }
 0x1bd   : > { %v1259_v1 = vpop.f32.mrf.mxu1 }
 0x1be   : > { %v745_v5 = vpack.c.bf16 %v1259_v1, %v1258_v63 }
 0x1bf   : > { %v712_v2 = vpop.f32.mrf.mxu1 }
 0x1c0   : > { %v744_v4 = vpack.c.bf16 %v712_v2, %v709_v0  ;;  %v1115_v0 = vsel %vm1794_vm0, 1.0, %v1418_v18 }
 0x1c1   : > { %v1262_v7 = vpop.f32.mrf.mxu1 }
 0x1c2   : > { %1288 = vmatprep.mubr.bf16.mxu0 %v744_v4 }
 0x1c3   : > { %v725_v8 = vpop.f32.mrf.mxu1  ;;  %1289 = vmatmul.mubr.bf16.gmra.mxu0 %v745_v5 }
 0x1c5   : > { %v1263_v10 = vpop.f32.mrf.mxu1 }
 0x1c6   : > { %v747_v14 = vpack.c.bf16 %v1263_v10, %v1262_v7  ;;  %v1117_v7 = vsel %vm1795_vm2, 1.0, %v1418_v18 }
 0x1c7   : > { %v728_v11 = vpop.f32.mrf.mxu1 }
 0x1c8   : > { %v746_v13 = vpack.c.bf16 %v728_v11, %v725_v8 }
 0x1ca   : > { %1292 = vmatprep.mubr.bf16.mxu0 %v746_v13 }
 0x1cb   : > { %1293 = vmatmul.mubr.bf16.gmra.mxu0 %v747_v14 }
 0x273   : > { %v1282_v15 = vpop.f32.mrf.mxu0 }
 0x274   : > { %v927_v29 = vsub.f32 %v1282_v15, %v1108_v24  ;;  %v1119_v24 = vsel %vm536_vm9, 1.0, %v1418_v18 }
 0x275   : > { %v846_v17 = vpop.f32.mrf.mxu0 }
 0x276   : > { %v925_v23 = vsub.f32 %v846_v17, %v1106_v20  ;;  %v943_v39 = vmul.f32 %v927_v29, %v927_v29 }
 0x277   : > { %v1283_v21 = vpop.f32.mrf.mxu0 }
 0x278   : > { %v941_v6 = vmul.f32 %v925_v23, %v925_v23  ;;  %v928_v35 = vsub.f32 %v1283_v21, %v1109_v32  ;;  %v1121_v32 = vsel %vm538_vm6, 1.0, %v1418_v18 }
 0x279   : > { %v849_v27 = vpop.f32.mrf.mxu0 }
 0x27a   : > { %v926_v30 = vsub.f32 %v849_v27, %v1107_v26  ;;  %v944_v44 = vmul.f32 %v928_v35, %v928_v35 }
 0x27b   : > { %v1286_v33 = vpop.f32.mrf.mxu0 }
 0x27c   : > { %v942_v36 = vmul.f32 %v926_v30, %v926_v30  ;;  %v931_v50 = vsub.f32 %v1286_v33, %v1112_v9 }
 0x27d   : > { %v862_v38 = vpop.f32.mrf.mxu0 }
 0x27e   : > { %v957_v41 = vadd.f32 %v942_v36, %v941_v6  ;;  %v929_v3 = vsub.f32 %v862_v38, %v1110_v12  ;;  %v947_v16 = vmul.f32 %v931_v50, %v931_v50 }
 0x27f   : > { %v1287_v42 = vpop.f32.mrf.mxu0 }
 0x280   : > { %v958_v45 = vadd.f32 %v957_v41, %v943_v39  ;;  %v945_v51 = vmul.f32 %v929_v3, %v929_v3  ;;  %v932_v56 = vsub.f32 %v1287_v42, %v1113_v53 }
 0x281   : > { %v865_v49 = vpop.f32.mrf.mxu0 }
 0x282   : > { %v959_v19 = vadd.f32 %v958_v45, %v944_v44  ;;  %v930_v52 = vsub.f32 %v865_v49, %v1111_v47  ;;  %v948_v62 = vmul.f32 %v932_v56, %v932_v56 }
 0x283   : > { %v1290_v54 = vpop.f32.mrf.mxu0 }
 0x284   : > { %v960_v55 = vadd.f32 %v959_v19, %v945_v51  ;;  %v946_v57 = vmul.f32 %v930_v52, %v930_v52  ;;  %v935_v2 = vsub.f32 %v1290_v54, %v1116_v22 }
 0x285   : > { %v878_v58 = vpop.f32.mrf.mxu0 }
 0x286   : > { %v961_v59 = vadd.f32 %v960_v55, %v946_v57  ;;  %v933_v60 = vsub.f32 %v878_v58, %v1114_v25  ;;  %v951_v28 = vmul.f32 %v935_v2, %v935_v2 }
 0x287   : > { %v1291_v61 = vpop.f32.mrf.mxu0 }
 0x288   : > { %v962_v63 = vadd.f32 %v961_v59, %v947_v16  ;;  %v949_v4 = vmul.f32 %v933_v60, %v933_v60  ;;  %v936_v11 = vsub.f32 %v1291_v61, %v1117_v7 }
 0x289   : > { %v881_v1 = vpop.f32.mrf.mxu0 }
 0x28a   : > { %v963_v31 = vadd.f32 %v962_v63, %v948_v62  ;;  %v934_v5 = vsub.f32 %v881_v1, %v1115_v0  ;;  %v952_v21 = vmul.f32 %v936_v11, %v936_v11 }
 0x28b   : > { %v1294_v8 = vpop.f32.mrf.mxu0 }
 0x28c   : > { %v964_v10 = vadd.f32 %v963_v31, %v949_v4  ;;  %v950_v13 = vmul.f32 %v934_v5, %v934_v5  ;;  %v939_v27 = vsub.f32 %v1294_v8, %v1120_v34 }
 0x28d   : > { %v894_v14 = vpop.f32.mrf.mxu0 }
 0x28e   : > { %v965_v15 = vadd.f32 %v964_v10, %v950_v13  ;;  %v937_v17 = vsub.f32 %v894_v14, %v1118_v37  ;;  %v955_v36 = vmul.f32 %v939_v27, %v939_v27 }
 0x28f   : > { %v1295_v20 = vpop.f32.mrf.mxu0 }
 0x290   : > { %v966_v23 = vadd.f32 %v965_v15, %v951_v28  ;;  %v953_v29 = vmul.f32 %v937_v17, %v937_v17  ;;  %v940_v6 = vsub.f32 %v1295_v20, %v1121_v32 }
 0x291   : > { %v897_v26 = vpop.f32.mrf.mxu0 }
 0x292   : > { %v967_v43 = vadd.f32 %v966_v23, %v952_v21  ;;  %v938_v30 = vsub.f32 %v897_v26, %v1119_v24  ;;  %v956_v12 = vmul.f32 %v940_v6, %v940_v6 }
 0x294   : > { %v968_v33 = vadd.f32 %v967_v43, %v953_v29  ;;  %v954_v35 = vmul.f32 %v938_v30, %v938_v30 }
 0x296   : > { %v969_v48 = vadd.f32 %v968_v33, %v954_v35 }
 0x298   : > { %v970_v38 = vadd.f32 %v969_v48, %v955_v36 }
 0x29a   : > { %v971_v40 = vadd.f32 %v970_v38, %v956_v12 }
 0x29c   : > { %972 = vadd.xlane.f32.xlu0 %v971_v40 }
 0x325   : > { %v973_v39 = vpop.xlane.xlu0 %972 }
 0x326   : > { %v974_v41 = vrot.slane %v973_v39, 4 }
 0x328   : > { %v975_v3 = vadd.f32 %v974_v41, %v973_v39 }
 0x32a   : > { %v976_v42 = vrot.slane %v975_v3, 2 }
 0x32c   : > { %v977_v44 = vadd.f32 %v976_v42, %v975_v3 }
 0x32e   : > { %v978_v45 = vrot.slane %v977_v44, 1 }
 0x330   : > { %v979_v46 = vadd.f32 %v978_v45, %v977_v44 }
 0x332   : > { %1296 = vpush %v979_v46 }
 0x363   : > { %s1297_s22 = spop %1296 }
 0x364   : > { %v981_v18 = vstv %s1297_s22 }
 0x365   : > { %982 = vst [vmem:[%s217_s16] sm:$0x1] %v981_v18 }
 0x366   : > { %1368 = shalt.err (!%p1365_p3)
}
 0x367   : > { %s1369_s11 = scalar_lea.hbm %s994_s26, 16  ;;  %s1373_s13 = scalar_lea.hbm %s1789_s5, 48 }
 0x368   : > { %p1370_p4 = scmp.ne.s32.totalorder %s994_s26, %s1369_s11  ;;  %p1374_p9 = scmp.lt.s32.totalorder %s994_s26, %s1789_s5 }
 0x369   : > { %p1375_p10 = scmp.lt.s32.totalorder %s1373_s13, %s1369_s11 }
 0x36a   : > { %p1371_p7 = pnand %p1370_p4, %p1485_p5 }
 0x36b   : > { %p1376_p11 = por %p1375_p10, %p1374_p9 }
 0x36c   : > { %p1372_p8 = pneg %p1371_p7 }
 0x36e   : > { %p1377_p12 = pnand %p1376_p11, %p1372_p8 }
 0x370   : > { %1380 = shalt.err (!%p1377_p12)
}
 0x371   : > { %1298 = dma.vmem_to_hbm [thread:$0]  (%p1485_p5), %s1745_s17, 16, %s994_s26, %s984_s30  }
 0x372 PF: > { %p1304_p13 = scmp.ge.s32.totalorder %s1415_s21, 2  ;;  %s1008_s16 = sand.u32 1, %s1403_s18  }
 0x373   : > { %s1009_s22 = scalar_lea.sflag [#allocation3], %s1008_s16 }
 0x374   : > { %p1301_p0 = pnand %p1304_p13, %p1489_p6 }
 0x376   : > { %p1302_p1 = pneg %p1301_p0 }
 0x378   : > { %1398 = dma.done.wait (%p1302_p1), %s1009_s22, 16  }
 0x379   : > { %1400 = vsyncadd (%p1302_p1), %s1009_s22, 4294967280  ;;  %p15_p2 = scmp.ge.s32.totalorder %s1473_s24, 5   ;;  %s1796_s18 = smov %s1407_s19 }
 0x37a   : > { %s1797_s19 = smov %s1411_s20  ;;  %s1798_s20 = smov %s1483_s27 }
 0x37b   : > { %s1799_s21 = smov %s1473_s24  ;;  %17 = sbr.rel (!%p15_p2) target bundleno = 3 (0x3), region = 75 }
 0x380   :  { %1013 = vsyncpa [#allocation3], 1 }
 0x381   :  { %1015 = vsyncpa [#allocation3 + $0x1], 1 }

</bundles_post_ra>
